<compile_context>
chip_gen: v7x
topology: tpu7x:2x2x1
jax: 0.10.0
libtpu: 0.0.40
codegen_flags: <defaults>
</compile_context>

<pallas_src>
import functools

import jax
import jax.numpy as jnp
from jax.experimental import pallas as pl
from jax.experimental.pallas import tpu as pltpu


def _layer_dims(nx, ny):
    # (out, in) per layer, PyTorch nn.Linear layout.
    return ((2 * nx, nx), (4 * nx, 2 * nx), (3 * nx, 4 * nx), (ny, 3 * nx))


def _row_offsets(dims):
    # 8-aligned row offset of each layer inside the packed parameter buffers.
    offs, off = [], 0
    for out_dim, _ in dims:
        offs.append(off)
        off += ((out_dim + 7) // 8) * 8
    return tuple(offs), off


def choose_tile_b(batch):
    # Lane-dense batch tile; small B -> a single grid step (B=200 -> 256).
    # Capped at 256: larger fully-unrolled tiles start to pressure vregs
    # (review: >=512 wants in-kernel sub-chunking).  On v7x one may prefer an
    # even number of grid steps so both TensorCores get work -- sweep if needed.
    return min(256, 128 * pl.cdiv(batch, 128))


def pack_params(params, *, nx, ny, tile_b):
    """Pack the 4 (out,in) weights into one (rows,128) buffer and the 4 biases,
    pre-broadcast along the lane axis, into one (rows,tile_b) buffer."""
    dims = _layer_dims(nx, ny)
    offs, rows = _row_offsets(dims)
    max_in = max(i for _, i in dims)
    w_cols = ((max_in + 127) // 128) * 128
    wp = jnp.zeros((rows, w_cols), jnp.float32)
    bp = jnp.zeros((rows, tile_b), jnp.float32)
    for layer, ((out_dim, in_dim), r) in enumerate(zip(dims, offs), start=1):
        wp = wp.at[r:r + out_dim, 0:in_dim].set(params[f"w{layer}"])
        bp = bp.at[r:r + out_dim, :].set(
            jnp.broadcast_to(params[f"b{layer}"], (out_dim, tile_b)))
    return wp, bp


def _mlp_kernel(x_ref, wp_ref, bp_ref, o_ref, *, ny, dims, offs):
    (o1, i1), (o2, i2), (o3, i3), (o4, i4) = dims
    r1, r2, r3, r4 = offs

    x = x_ref[...]                                  # (tile_b, nx), native layout

    # Layer 1: contract the feature axis of both operands -> (o1, tile_b);
    # batch rides the lane axis from here on, no explicit transpose needed.
    h = jax.lax.dot_general(
        wp_ref[r1:r1 + o1, 0:i1], x,
        dimension_numbers=(((1,), (1,)), ((), ())),
        preferred_element_type=jnp.float32)
    h = jnp.maximum(h + bp_ref[r1:r1 + o1, :], 0.0)

    h = jnp.dot(wp_ref[r2:r2 + o2, 0:i2], h, preferred_element_type=jnp.float32)
    h = jnp.maximum(h + bp_ref[r2:r2 + o2, :], 0.0)

    h = jnp.dot(wp_ref[r3:r3 + o3, 0:i3], h, preferred_element_type=jnp.float32)
    h = jnp.maximum(h + bp_ref[r3:r3 + o3, :], 0.0)

    z = jnp.dot(wp_ref[r4:r4 + o4, 0:i4], h, preferred_element_type=jnp.float32)
    z = z + bp_ref[r4:r4 + o4, :]                   # (ny, tile_b)

    if ny == 2:
        # row 0 -> sigmoid, row 1 -> tanh  (== torch.cat((sig(x0), tanh(x1)), 1)),
        # emitted as ONE unmasked full-tile store; sigmoid/tanh both ride the
        # EUP so computing both over all of z is free; the select is one VPU op.
        rows = jax.lax.broadcasted_iota(jnp.int32, z.shape, 0)
        o_ref[...] = jnp.where(rows == 0, jax.nn.sigmoid(z), jnp.tanh(z))
    else:
        o_ref[...] = jax.nn.sigmoid(z)


def mlp_forward(x, w_packed, b_packed, *, nx, ny, tile_b):
    """x: (B, nx) float32 in native layout; w_packed/b_packed from pack_params."""
    B, nx_in = x.shape
    assert nx_in == nx
    assert b_packed.shape[1] == tile_b, "bias pack width must equal tile_b"

    n_tiles = pl.cdiv(B, tile_b)
    b_pad = n_tiles * tile_b
    if b_pad != B:
        # Single cheap pad; padded batch rows stay isolated in their own lanes
        # and are sliced off below.
        x = jnp.pad(x, ((0, b_pad - B), (0, 0)))

    dims = _layer_dims(nx, ny)
    offs, _ = _row_offsets(dims)

    out_t = pl.pallas_call(
        functools.partial(_mlp_kernel, ny=ny, dims=dims, offs=offs),
        out_shape=jax.ShapeDtypeStruct((ny, b_pad), jnp.float32),
        grid=(n_tiles,),
        in_specs=[
            # x tile in native (batch, feature) layout; last dim == full dim.
            pl.BlockSpec((tile_b, nx), lambda i: (i, 0)),
            # Packed params: whole array as one block with a constant
            # index_map => DMA'd once, resident in VMEM across all grid steps.
            pl.BlockSpec(w_packed.shape, lambda i: (0, 0)),
            pl.BlockSpec(b_packed.shape, lambda i: (0, 0)),
        ],
        out_specs=pl.BlockSpec((ny, tile_b), lambda i: (0, i)),
        compiler_params=pltpu.CompilerParams(
            # Batch tiles are independent -> shard across both TCs on v7x;
            # no-op on single-TC v5e/v6e.
            dimension_semantics=("parallel",)),
    )(x, w_packed, b_packed)

    return out_t[:, :B].T


def init_params(key, nx=8, ny=2):
    """nn.Linear-style U(-1/sqrt(fan_in), 1/sqrt(fan_in)) init.
    Weights stored as (out, in) (PyTorch layout); biases as (out, 1)."""
    dims = _layer_dims(nx, ny)
    params = {}
    keys = jax.random.split(key, 2 * len(dims))
    for i, (fan_out, fan_in) in enumerate(dims):
        bound = 1.0 / (float(fan_in) ** 0.5)
        params[f"w{i + 1}"] = jax.random.uniform(
            keys[2 * i], (fan_out, fan_in), jnp.float32, -bound, bound)
        params[f"b{i + 1}"] = jax.random.uniform(
            keys[2 * i + 1], (fan_out, 1), jnp.float32, -bound, bound)
    return params


def mlp_reference(x, params, ny):
    h = jax.nn.relu(x @ params["w1"].T + params["b1"][:, 0])
    h = jax.nn.relu(h @ params["w2"].T + params["b2"][:, 0])
    h = jax.nn.relu(h @ params["w3"].T + params["b3"][:, 0])
    z = h @ params["w4"].T + params["b4"][:, 0]
    if ny == 2:
        return jnp.concatenate(
            [jax.nn.sigmoid(z[:, :1]), jnp.tanh(z[:, 1:2])], axis=1)
    return jax.nn.sigmoid(z)


if __name__ == "__main__":
    nx, ny = 8, 2
    batch = 200          # deliberately not a multiple of 128: exercises padding path

    key = jax.random.PRNGKey(0)
    pkey, xkey = jax.random.split(key)
    params = init_params(pkey, nx=nx, ny=ny)
    x = jax.random.normal(xkey, (batch, nx), jnp.float32)

    tile_b = choose_tile_b(batch)                    # 256 -> grid=(1,)
    w_packed, b_packed = pack_params(params, nx=nx, ny=ny, tile_b=tile_b)

    out = mlp_forward(x, w_packed, b_packed, nx=nx, ny=ny, tile_b=tile_b)
    out = jax.block_until_ready(out)

    ref = mlp_reference(x, params, ny)
    assert out.shape == (batch, ny)
    assert jnp.allclose(out, ref, atol=1e-5, rtol=1e-5)
    print("KERNEL_OK")
</pallas_src>

<mosaic_0001>
module attributes {stable_mosaic.version = 11 : i64} {
  func.func @_mlp_kernel(%arg0: i32, %arg1: memref<256x8xf32, #tpu.memory_space<vmem>>, %arg2: memref<80x128xf32, #tpu.memory_space<vmem>>, %arg3: memref<80x256xf32, #tpu.memory_space<vmem>>, %arg4: memref<2x256xf32, #tpu.memory_space<vmem>>) attributes {dimension_semantics = [#tpu.dimension_semantics<parallel>], iteration_bounds = array<i64: 1>, scalar_prefetch = 0 : i64, scratch_operands = 0 : i64, tpu.core_type = #tpu.core_type<tc>, window_params = [{transform_indices = @transform_0, window_bounds = array<i64: 256, 8>}, {pipeline_mode = #tpu.pipeline_mode<synchronous>, transform_indices = @transform_1, window_bounds = array<i64: 80, 128>}, {pipeline_mode = #tpu.pipeline_mode<synchronous>, transform_indices = @transform_2, window_bounds = array<i64: 80, 256>}, {transform_indices = @transform_3, window_bounds = array<i64: 2, 256>}]} {
    %c0 = arith.constant 0 : index
    %c0_0 = arith.constant 0 : index
    %0 = vector.load %arg1[%c0, %c0_0] : memref<256x8xf32, #tpu.memory_space<vmem>>, vector<256x8xf32>
    %c0_1 = arith.constant 0 : index
    %c0_2 = arith.constant 0 : index
    %1 = vector.load %arg2[%c0_1, %c0_2] : memref<80x128xf32, #tpu.memory_space<vmem>>, vector<16x8xf32>
    %cst = arith.constant dense<0.000000e+00> : vector<16x256xf32>
    %2 = tpu.matmul %1, %0, %cst {dimension_numbers = #tpu.dot_dimension_numbers<[1], [1], [0], [0], [0, 0, 1, 0], [], []>} : vector<16x8xf32>, vector<256x8xf32>, vector<16x256xf32> -> vector<16x256xf32>
    %c0_3 = arith.constant 0 : index
    %c0_4 = arith.constant 0 : index
    %3 = vector.load %arg3[%c0_3, %c0_4] : memref<80x256xf32, #tpu.memory_space<vmem>>, vector<16x256xf32>
    %4 = arith.addf %2, %3 : vector<16x256xf32>
    %cst_5 = arith.constant 0.000000e+00 : f32
    %5 = vector.broadcast %cst_5 : f32 to vector<16x256xf32>
    %6 = arith.maximumf %4, %5 : vector<16x256xf32>
    %c16 = arith.constant 16 : index
    %c0_6 = arith.constant 0 : index
    %7 = vector.load %arg2[%c16, %c0_6] : memref<80x128xf32, #tpu.memory_space<vmem>>, vector<32x16xf32>
    %cst_7 = arith.constant dense<0.000000e+00> : vector<32x256xf32>
    %8 = tpu.matmul %7, %6, %cst_7 {dimension_numbers = #tpu.dot_dimension_numbers<[1], [0], [0], [1], [0, 0, 1, 1], [], []>} : vector<32x16xf32>, vector<16x256xf32>, vector<32x256xf32> -> vector<32x256xf32>
    %c16_8 = arith.constant 16 : index
    %c0_9 = arith.constant 0 : index
    %9 = vector.load %arg3[%c16_8, %c0_9] : memref<80x256xf32, #tpu.memory_space<vmem>>, vector<32x256xf32>
    %10 = arith.addf %8, %9 : vector<32x256xf32>
    %cst_10 = arith.constant 0.000000e+00 : f32
    %11 = vector.broadcast %cst_10 : f32 to vector<32x256xf32>
    %12 = arith.maximumf %10, %11 : vector<32x256xf32>
    %c48 = arith.constant 48 : index
    %c0_11 = arith.constant 0 : index
    %13 = vector.load %arg2[%c48, %c0_11] : memref<80x128xf32, #tpu.memory_space<vmem>>, vector<24x32xf32>
    %cst_12 = arith.constant dense<0.000000e+00> : vector<24x256xf32>
    %14 = tpu.matmul %13, %12, %cst_12 {dimension_numbers = #tpu.dot_dimension_numbers<[1], [0], [0], [1], [0, 0, 1, 1], [], []>} : vector<24x32xf32>, vector<32x256xf32>, vector<24x256xf32> -> vector<24x256xf32>
    %c48_13 = arith.constant 48 : index
    %c0_14 = arith.constant 0 : index
    %15 = vector.load %arg3[%c48_13, %c0_14] : memref<80x256xf32, #tpu.memory_space<vmem>>, vector<24x256xf32>
    %16 = arith.addf %14, %15 : vector<24x256xf32>
    %cst_15 = arith.constant 0.000000e+00 : f32
    %17 = vector.broadcast %cst_15 : f32 to vector<24x256xf32>
    %18 = arith.maximumf %16, %17 : vector<24x256xf32>
    %c72 = arith.constant 72 : index
    %c0_16 = arith.constant 0 : index
    %19 = vector.load %arg2[%c72, %c0_16] : memref<80x128xf32, #tpu.memory_space<vmem>>, vector<2x24xf32>
    %cst_17 = arith.constant dense<0.000000e+00> : vector<2x256xf32>
    %20 = tpu.matmul %19, %18, %cst_17 {dimension_numbers = #tpu.dot_dimension_numbers<[1], [0], [0], [1], [0, 0, 1, 1], [], []>} : vector<2x24xf32>, vector<24x256xf32>, vector<2x256xf32> -> vector<2x256xf32>
    %c72_18 = arith.constant 72 : index
    %c0_19 = arith.constant 0 : index
    %21 = vector.load %arg3[%c72_18, %c0_19] : memref<80x256xf32, #tpu.memory_space<vmem>>, vector<2x256xf32>
    %22 = arith.addf %20, %21 : vector<2x256xf32>
    %23 = tpu.iota {dimensions = array<i32: 0>} : vector<2x256xi32>
    %c0_i32 = arith.constant 0 : i32
    %24 = vector.broadcast %c0_i32 : i32 to vector<2x256xi32>
    %25 = arith.cmpi eq, %23, %24 : vector<2x256xi32>
    %26 = arith.negf %22 : vector<2x256xf32>
    %27 = math.exp %26 : vector<2x256xf32>
    %cst_20 = arith.constant 1.000000e+00 : f32
    %28 = vector.broadcast %cst_20 : f32 to vector<2x256xf32>
    %29 = arith.addf %28, %27 : vector<2x256xf32>
    %30 = arith.divf %28, %29 : vector<2x256xf32>
    %31 = math.tanh %22 : vector<2x256xf32>
    %32 = arith.select %25, %30, %31 : vector<2x256xi1>, vector<2x256xf32>
    %c0_21 = arith.constant 0 : index
    %c0_22 = arith.constant 0 : index
    %33 = vector.load %arg4[%c0_21, %c0_22] : memref<2x256xf32, #tpu.memory_space<vmem>>, vector<2x256xf32>
    tpu.vector_store %arg4[%c0_21, %c0_22], %32 {strides = array<i32>} : memref<2x256xf32, #tpu.memory_space<vmem>>, vector<2x256xf32>,
    return
  }
  func.func @transform_0(%arg0: i32) -> (i32, i32) {
    %c0_i32 = arith.constant 0 : i32
    %c0_i32_0 = arith.constant 0 : i32
    return %arg0, %c0_i32 : i32, i32
  }
  func.func @transform_1(%arg0: i32) -> (i32, i32) {
    %c0_i32 = arith.constant 0 : i32
    %c0_i32_0 = arith.constant 0 : i32
    %c0_i32_1 = arith.constant 0 : i32
    return %c0_i32, %c0_i32_0 : i32, i32
  }
  func.func @transform_2(%arg0: i32) -> (i32, i32) {
    %c0_i32 = arith.constant 0 : i32
    %c0_i32_0 = arith.constant 0 : i32
    %c0_i32_1 = arith.constant 0 : i32
    return %c0_i32, %c0_i32_0 : i32, i32
  }
  func.func @transform_3(%arg0: i32) -> (i32, i32) {
    %c0_i32 = arith.constant 0 : i32
    %c0_i32_0 = arith.constant 0 : i32
    return %c0_i32, %arg0 : i32, i32
  }
}

</mosaic_0001>

<bundles_post_ra>
// kernel: tpu_custom_call.1
= control target key start
LH: loop header
LB: loop body
LE: loop exit
PB: predicated region body
PF: predicated region fallthrough
CT: control target
= control target key end

     0   :  { %vm53_vm0 = vcmask 64512   ;;  %s1043_s0 = inlined_call_operand.vmem [shape: f32[256,8], index: 0, kind: input, shape index: {}]   ;;  %s1044_s1 = inlined_call_operand.vmem [shape: f32[80,128], index: 1, kind: input, shape index: {}]   ;;  %s1045_s2 = inlined_call_operand.vmem [shape: f32[80,256], index: 2, kind: input, shape index: {}]   ;;  %s1046_s3 = inlined_call_operand.hbm [shape: f32[2,256], index: 3, kind: output, shape index: {}]  }
   0x1   :  { %v31_v0 = vld [vmem:[%s1043_s0 + $0x80] sm:$0xff]  ;;  %v32_v1 = vld [vmem:[%s1043_s0 + $0x88] sm:$0xff]  ;;  %vm806_vm1 = vmpackc.low %vm53_vm0, %vm53_vm0 }
   0x2   :  { %v15_v2 = vld [vmem:[%s1043_s0] sm:$0xff]  ;;  %v671_v3 = vpack.c.bf16 %v32_v1, %v31_v0  ;;  %v16_v5 = vld [vmem:[%s1043_s0 + $0x8] sm:$0xff]  ;;  %v33_v6 = vld [vmem:[%s1043_s0 + $0x90] sm:$0xff] }
   0x3   :  { %v674_v7 = vpack.c.bf16 %v16_v5, %v15_v2  ;;  %v34_v8 = vld [vmem:[%s1043_s0 + $0x98] sm:$0xff]  ;;  %v17_v10 = vld [vmem:[%s1043_s0 + $0x10] sm:$0xff]  ;;  %v35_v12 = vld [vmem:[%s1043_s0 + $0xa0] sm:$0xff] }
   0x4   :  { %673 = vmatprep.subr.msk.bf16.mxu0 %vm806_vm1, %v671_v3  ;;  %v677_v9 = vpack.c.bf16 %v34_v8, %v33_v6  ;;  %v18_v11 = vld [vmem:[%s1043_s0 + $0x18] sm:$0xff]  ;;  %v36_v13 = vld [vmem:[%s1043_s0 + $0xa8] sm:$0xff]  ;;  %v47_v16 = vld [vmem:[%s1044_s1] sm:$0xff] }
   0x5   :  { %676 = vmatpush3.bf16.xpose.msk.msra.mxu0 %vm806_vm1, %v674_v7  ;;  %v680_v14 = vpack.c.bf16 %v18_v11, %v17_v10  ;;  %v683_v15 = vpack.c.bf16 %v36_v13, %v35_v12  ;;  %667 = vmatprep.mubr.msk.f32.mxu0 %vm53_vm0, %v47_v16 }
   0x6   :  { %679 = vmatprep.subr.msk.bf16.mxu0 %vm806_vm1, %v677_v9 }
   0xd   :  { %682 = vmatpush3.bf16.xpose.msk.msra.mxu0 %vm806_vm1, %v680_v14 }
   0xe   :  { %8 = vsyncpa [#allocation3], 0  ;;  %685 = vmatprep.subr.msk.bf16.mxu0 %vm806_vm1, %v683_v15  ;;  %v19_v17 = vld [vmem:[%s1043_s0 + $0x20] sm:$0xff]  ;;  %v20_v18 = vld [vmem:[%s1043_s0 + $0x28] sm:$0xff]  ;;  %v773_v51 = vmov 0.0   ;;  %vm249_vm2 = vcmask 130048  }
   0xf   :  { %v37_v19 = vld [vmem:[%s1043_s0 + $0xb0] sm:$0xff]  ;;  %v38_v20 = vld [vmem:[%s1043_s0 + $0xb8] sm:$0xff]  ;;  %v686_v21 = vpack.c.bf16 %v20_v18, %v19_v17  ;;  %v39_v25 = vld [vmem:[%s1043_s0 + $0xc0] sm:$0xff]  ;;  %326 = vmatprep.mubr.f32.mxu1 %v773_v51  ;;  %vm368_vm3 = vcmask 261120   ;;  %vm470_vm4 = vcmask 195584  }
  0x10   :  { %v689_v22 = vpack.c.bf16 %v38_v20, %v37_v19  ;;  %v21_v23 = vld [vmem:[%s1043_s0 + $0x30] sm:$0xff]  ;;  %v22_v24 = vld [vmem:[%s1043_s0 + $0x38] sm:$0xff]  ;;  %v40_v26 = vld [vmem:[%s1043_s0 + $0xc8] sm:$0xff] }
  0x11   :  { %v692_v27 = vpack.c.bf16 %v22_v24, %v21_v23  ;;  %v695_v28 = vpack.c.bf16 %v40_v26, %v39_v25  ;;  %v23_v29 = vld [vmem:[%s1043_s0 + $0x40] sm:$0xff]  ;;  %v24_v30 = vld [vmem:[%s1043_s0 + $0x48] sm:$0xff]  ;;  %v41_v31 = vld [vmem:[%s1043_s0 + $0xd0] sm:$0xff] }
  0x12   :  { %v42_v32 = vld [vmem:[%s1043_s0 + $0xd8] sm:$0xff]  ;;  %v698_v33 = vpack.c.bf16 %v24_v30, %v23_v29  ;;  %v25_v35 = vld [vmem:[%s1043_s0 + $0x50] sm:$0xff]  ;;  %v43_v37 = vld [vmem:[%s1043_s0 + $0xe0] sm:$0xff] }
  0x13   :  { %v701_v34 = vpack.c.bf16 %v42_v32, %v41_v31  ;;  %v26_v36 = vld [vmem:[%s1043_s0 + $0x58] sm:$0xff]  ;;  %v44_v38 = vld [vmem:[%s1043_s0 + $0xe8] sm:$0xff]  ;;  %v27_v41 = vld [vmem:[%s1043_s0 + $0x60] sm:$0xff] }
  0x14   :  { %v704_v39 = vpack.c.bf16 %v26_v36, %v25_v35  ;;  %v707_v40 = vpack.c.bf16 %v44_v38, %v43_v37  ;;  %v28_v42 = vld [vmem:[%s1043_s0 + $0x68] sm:$0xff]  ;;  %v45_v43 = vld [vmem:[%s1043_s0 + $0xf0] sm:$0xff]  ;;  %v46_v44 = vld [vmem:[%s1043_s0 + $0xf8] sm:$0xff] }
  0x15   :  { %688 = vmatpush3.bf16.xpose.msk.msra.mxu0 %vm806_vm1, %v686_v21  ;;  %v710_v45 = vpack.c.bf16 %v28_v42, %v27_v41  ;;  %v713_v46 = vpack.c.bf16 %v46_v44, %v45_v43  ;;  %v29_v47 = vld [vmem:[%s1043_s0 + $0x70] sm:$0xff]  ;;  %v30_v48 = vld [vmem:[%s1043_s0 + $0x78] sm:$0xff]  ;;  %v48_v50 = vld [vmem:[%s1044_s1 + $0x8] sm:$0xff] }
  0x16   :  { %691 = vmatprep.subr.msk.bf16.mxu0 %vm806_vm1, %v689_v22  ;;  %v716_v49 = vpack.c.bf16 %v30_v48, %v29_v47  ;;  %v49_v52 = vld [vmem:[%s1045_s2] sm:$0xff]  ;;  %v50_v54 = vld [vmem:[%s1045_s2 + $0x8] sm:$0xff]  ;;  %v51_v56 = vld [vmem:[%s1045_s2 + $0x10] sm:$0xff] }
  0x17   :  { %v52_v58 = vld [vmem:[%s1045_s2 + $0x18] sm:$0xff]  ;;  %v237_v6 = vld [vmem:[%s1044_s1 + $0x10] sm:$0xff]  ;;  %v239_v8 = vld [vmem:[%s1044_s1 + $0x20] sm:$0xff] }
  0x18   :  { %v238_v7 = vld [vmem:[%s1044_s1 + $0x18] sm:$0xff]  ;;  %v240_v9 = vld [vmem:[%s1044_s1 + $0x28] sm:$0xff]  ;;  %v241_v10 = vld [vmem:[%s1045_s2 + $0x20] sm:$0xff] }
  0x19   :  { %v242_v12 = vld [vmem:[%s1045_s2 + $0x28] sm:$0xff]  ;;  %v243_v14 = vld [vmem:[%s1045_s2 + $0x30] sm:$0xff]  ;;  %v245_v26 = vld [vmem:[%s1045_s2 + $0x40] sm:$0xff] }
  0x1a   :  { %v246_v29 = vld [vmem:[%s1045_s2 + $0x48] sm:$0xff]  ;;  %v247_v32 = vld [vmem:[%s1045_s2 + $0x50] sm:$0xff]  ;;  %v360_v47 = vld [vmem:[%s1044_s1 + $0x38] sm:$0xff] }
  0x1b   :  { %v361_v48 = vld [vmem:[%s1044_s1 + $0x40] sm:$0xff] }
  0x1d   :  { %694 = vmatpush3.bf16.xpose.msk.msra.mxu0 %vm806_vm1, %v692_v27 }
  0x1e   :  { %697 = vmatprep.subr.msk.bf16.mxu0 %vm806_vm1, %v695_v28 }
  0x25   :  { %700 = vmatpush3.bf16.xpose.msk.msra.mxu0 %vm806_vm1, %v698_v33 }
  0x26   :  { %703 = vmatprep.subr.msk.bf16.mxu0 %vm806_vm1, %v701_v34  ;;  %v248_v34 = vld [vmem:[%s1045_s2 + $0x58] sm:$0xff] }
  0x2d   :  { %706 = vmatpush3.bf16.xpose.msk.msra.mxu0 %vm806_vm1, %v704_v39 }
  0x2e   :  { %709 = vmatprep.subr.msk.bf16.mxu0 %vm806_vm1, %v707_v40 }
  0x35   :  { %712 = vmatpush3.bf16.xpose.msk.msra.mxu0 %vm806_vm1, %v710_v45 }
  0x36   :  { %715 = vmatprep.subr.msk.bf16.mxu0 %vm806_vm1, %v713_v46  ;;  %v359_v46 = vld [vmem:[%s1044_s1 + $0x30] sm:$0xff] }
  0x3d   :  { %718 = vmatpush3.bf16.xpose.msk.msra.mxu0 %vm806_vm1, %v716_v49  ;;  %v362_v49 = vld [vmem:[%s1045_s2 + $0x60] sm:$0xff] }
  0x44   :  { %668 = vmatmul.mubr.msk.f32.vlgmr.msra.gmra.mrb[0].mxu0 %vm53_vm0, %v47_v16  ;;  %v244_v16 = vld [vmem:[%s1045_s2 + $0x38] sm:$0xff] }
  0x45   :  { %669 = vmatprep.mubr.msk.f32.mxu0 %vm53_vm0, %v48_v50 }
  0x48   :  { %670 = vmatmul.mubr.msk.f32.gmra.mrb[2].mxu0 %vm53_vm0, %v48_v50 }
 0x117   :  { %v222_v53 = vpop.f32.mrb[0].mxu0 }
 0x118   :  { %v224_v55 = vpop.f32.mrb[1].mxu0  ;;  %v223_v57 = vadd.f32 %v222_v53, %v49_v52  ;;  %v363_v52 = vld [vmem:[%s1045_s2 + $0x68] sm:$0xff] }
 0x119   :  { %v225_v59 = vadd.f32 %v224_v55, %v50_v54  ;;  %v364_v54 = vld [vmem:[%s1045_s2 + $0x70] sm:$0xff] }
 0x11a   :  { %v233_v0 = vmax.f32 %v223_v57, 0.0 }
 0x11b   :  { %v228_v60 = vpop.f32.mrb[2].mxu0  ;;  %v234_v2 = vmax.f32 %v225_v59, 0.0 }
 0x11c   :  { %v229_v61 = vadd.f32 %v228_v60, %v51_v56  ;;  %v230_v62 = vpop.f32.mrb[3].mxu0  ;;  %v365_v56 = vld [vmem:[%s1045_s2 + $0x78] sm:$0xff] }
 0x11d   :  { %v231_v63 = vadd.f32 %v230_v62, %v52_v58 }
 0x11e   :  { %v235_v1 = vmax.f32 %v229_v61, 0.0 }
 0x11f   :  { %v236_v3 = vmax.f32 %v231_v63, 0.0  ;;  %v367_v63 = vld [vmem:[%s1045_s2 + $0x88] sm:$0xff] }
 0x120   :  { %v721_v4 = vpack.c.bf16 %v235_v1, %v233_v0 }
 0x121   :  { %v719_v5 = vpack.c.bf16 %v236_v3, %v234_v2  ;;  %v366_v2 = vld [vmem:[%s1045_s2 + $0x80] sm:$0xff] }
 0x123   :  { %720 = vmatprep.subr.bf16.mxu1 %v719_v5 }
 0x124   :  { %722 = vmatpush1.bf16.msra.mxu1 %v721_v4 }
 0x127   :  { %624 = vmatmul.mubr.msk.f32.vlgmr.msra.gmra.mrb[0].mxu1 %vm249_vm2, %v237_v6 }
 0x128   :  { %332 = vmatprep.mubr.f32.mxu1 %v773_v51 }
 0x12b   :  { %625 = vmatmul.mubr.msk.f32.gmra.mrb[2].mxu1 %vm249_vm2, %v238_v7 }
 0x12c   :  { %338 = vmatprep.mubr.f32.mxu1 %v773_v51 }
 0x12f   :  { %626 = vmatmul.mubr.msk.f32.gmra.mrb[4].mxu1 %vm249_vm2, %v239_v8 }
 0x130   :  { %344 = vmatprep.mubr.f32.mxu1 %v773_v51 }
 0x133   :  { %627 = vmatmul.mubr.msk.f32.gmra.mrb[6].mxu1 %vm249_vm2, %v240_v9 }
 0x134   :  { %442 = vmatprep.mubr.f32.mxu1 %v773_v51 }
 0x1fa   :  { %v328_v11 = vpop.f32.mrb[0].mxu1 }
 0x1fb   :  { %v330_v13 = vpop.f32.mrb[1].mxu1  ;;  %v329_v15 = vadd.f32 %v328_v11, %v241_v10  ;;  %v467_v11 = vld [vmem:[%s1044_s1 + $0x48] sm:$0x3]  ;;  %s774_s1 = smov [#allocation2]  }
 0x1fc   :  { %v331_v17 = vadd.f32 %v330_v13, %v242_v12  ;;  %v468_v12 = vld [vmem:[%s1045_s2 + $0x90] sm:$0x3]  ;;  %v469_v13 = vld [vmem:[%s1045_s2 + $0x98] sm:$0x3]  ;;  %s582_s2 = sshll.u32 %s774_s1, 4  ;;  %s583_s2 = int_to_ptr.vmem [resolvable:$true] %s582_s2 }
 0x1fd   :  { %v351_v22 = vmax.f32 %v329_v15, 0.0  ;;  %s749_s26 = scalar_lea.vmem %s583_s2, 64  ;;  %p754_p1 = scmp.lt.s32.totalorder %s583_s2, %s583_s2 }
 0x1fe   :  { %v334_v18 = vpop.f32.mrb[2].mxu1  ;;  %v352_v24 = vmax.f32 %v331_v17, 0.0  ;;  %p750_p0 = scmp.ne.s32.totalorder %s583_s2, %s749_s26  ;;  %p755_p2 = scmp.lt.s32.totalorder %s749_s26, %s749_s26 }
 0x1ff   :  { %v335_v19 = vadd.f32 %v334_v18, %v243_v14  ;;  %v336_v20 = vpop.f32.mrb[3].mxu1 }
 0x200   :  { %v337_v21 = vadd.f32 %v336_v20, %v244_v16  ;;  %p756_p3 = por %p755_p2, %p754_p1 }
 0x201   :  { %v353_v23 = vmax.f32 %v335_v19, 0.0 }
 0x202   :  { %v354_v25 = vmax.f32 %v337_v21, 0.0  ;;  %v340_v27 = vpop.f32.mrb[4].mxu1  ;;  %p757_p4 = pnand %p756_p3, %p750_p0 }
 0x203   :  { %v725_v28 = vpack.c.bf16 %v353_v23, %v351_v22  ;;  %v342_v30 = vpop.f32.mrb[5].mxu1  ;;  %v341_v33 = vadd.f32 %v340_v27, %v245_v26 }
 0x204   :  { %v723_v31 = vpack.c.bf16 %v354_v25, %v352_v24  ;;  %v343_v35 = vadd.f32 %v342_v30, %v246_v29  ;;  %v545_v24 = vlaneseq }
 0x205   :  { %v355_v40 = vmax.f32 %v341_v33, 0.0 }
 0x206   :  { %v346_v36 = vpop.f32.mrb[6].mxu1  ;;  %724 = vmatprep.subr.bf16.mxu1 %v723_v31  ;;  %v356_v42 = vmax.f32 %v343_v35, 0.0  ;;  %v546_v25 = vshrl.u32 %v545_v24, 7 }
 0x207   :  { %v347_v37 = vadd.f32 %v346_v36, %v247_v32  ;;  %v348_v38 = vpop.f32.mrb[7].mxu1  ;;  %726 = vmatpush1.bf16.msra.mxu1 %v725_v28 }
 0x208   :  { %v349_v39 = vadd.f32 %v348_v38, %v248_v34  ;;  %vm547_vm5 = vcmp.eq.s32.totalorder %v546_v25, 0 }
 0x209   :  { %v357_v41 = vmax.f32 %v347_v37, 0.0 }
 0x20a   :  { %v358_v43 = vmax.f32 %v349_v39, 0.0 }
 0x20b   :  { %v729_v44 = vpack.c.bf16 %v357_v41, %v355_v40 }
 0x20c   :  { %v727_v45 = vpack.c.bf16 %v358_v43, %v356_v42 }
 0x20e   :  { %728 = vmatprep.subr.bf16.mxu1 %v727_v45 }
 0x20f   :  { %730 = vmatpush1.bf16.msra.mxu1 %v729_v44 }
 0x212   :  { %628 = vmatmul.mubr.msk.f32.vlgmr.msra.gmra.mrb[8].mxu1 %vm368_vm3, %v359_v46 }
 0x213   :  { %448 = vmatprep.mubr.f32.mxu1 %v773_v51 }
 0x216   :  { %629 = vmatmul.mubr.msk.f32.gmra.mrb[10].mxu1 %vm368_vm3, %v360_v47 }
 0x217   :  { %454 = vmatprep.mubr.f32.mxu1 %v773_v51 }
 0x21a   :  { %630 = vmatmul.mubr.msk.f32.gmra.mrb[12].mxu1 %vm368_vm3, %v361_v48 }
 0x21b   :  { %538 = vmatprep.mubr.f32.mxu1 %v773_v51 }
 0x2e5   :  { %v444_v50 = vpop.f32.mrb[8].mxu1 }
 0x2e6   :  { %v446_v53 = vpop.f32.mrb[9].mxu1  ;;  %v445_v55 = vadd.f32 %v444_v50, %v362_v49 }
 0x2e7   :  { %v447_v51 = vadd.f32 %v446_v53, %v363_v52 }
 0x2e8   :  { %v461_v61 = vmax.f32 %v445_v55, 0.0 }
 0x2e9   :  { %v450_v57 = vpop.f32.mrb[10].mxu1  ;;  %v462_v0 = vmax.f32 %v447_v51, 0.0 }
 0x2ea   :  { %v451_v58 = vadd.f32 %v450_v57, %v364_v54  ;;  %v452_v59 = vpop.f32.mrb[11].mxu1 }
 0x2eb   :  { %v453_v60 = vadd.f32 %v452_v59, %v365_v56 }
 0x2ec   :  { %v463_v62 = vmax.f32 %v451_v58, 0.0 }
 0x2ed   :  { %v464_v1 = vmax.f32 %v453_v60, 0.0  ;;  %v456_v3 = vpop.f32.mrb[12].mxu1 }
 0x2ee   :  { %v733_v4 = vpack.c.bf16 %v463_v62, %v461_v61  ;;  %v458_v5 = vpop.f32.mrb[13].mxu1  ;;  %v457_v8 = vadd.f32 %v456_v3, %v366_v2 }
 0x2ef   :  { %v731_v6 = vpack.c.bf16 %v464_v1, %v462_v0  ;;  %v459_v7 = vadd.f32 %v458_v5, %v367_v63 }
 0x2f0   :  { %v465_v10 = vmax.f32 %v457_v8, 0.0 }
 0x2f1   :  { %v466_v9 = vmax.f32 %v459_v7, 0.0  ;;  %732 = vmatprep.subr.bf16.mxu1 %v731_v6 }
 0x2f2   :  { %734 = vmatpush1.bf16.msra.mxu1 %v733_v4 }
 0x2f3   :  { %478 = vmatprep.subr.mxu1 %v466_v9 }
 0x2f6   :  { %479 = vmatpush1.msra.mxu1 %v465_v10 }
 0x2f7   :  { %631 = vmatmul.mubr.msk.f32.vlgmr.msra.gmra.mrb[14].mxu1 %vm470_vm4, %v467_v11 }
 0x3ca   :  { %v540_v14 = vpop.f32.mrb[14].mxu1 }
 0x3cb   :  { %v541_v15 = vadd.f32 %v540_v14, %v468_v12  ;;  %v542_v16 = vpop.f32.mrb[15].mxu1 }
 0x3cc   :  { %v543_v17 = vadd.f32 %v542_v16, %v469_v13 }
 0x3cd   :  { %v632_v18 = vmul.f32 -1.442695, %v541_v15 }
 0x3ce   :  { %v633_v19 = vmul.f32 -1.442695, %v543_v17 }
 0x3cf   :  { %737 = vpow2.f32 %v632_v18 }
 0x3d0   :  { %739 = vpow2.f32 %v633_v19 }
 0x3d1   :  { %741 = vtanh.f32 %v541_v15 }
 0x3d2   :  { %743 = vtanh.f32 %v543_v17 }
 0x3d9   :  { %v738_v20 = vpop.eup %737 }
 0x3da   :  { %v740_v21 = vpop.eup %739  ;;  %v554_v22 = vadd.f32 1.0, %v738_v20 }
 0x3db   :  { %v555_v23 = vadd.f32 1.0, %v740_v21  ;;  %v742_v26 = vpop.eup %741 }
 0x3dc   :  { %745 = vrcp.f32 %v554_v22  ;;  %v744_v27 = vpop.eup %743 }
 0x3dd   :  { %747 = vrcp.f32 %v555_v23 }
 0x3e6   :  { %v746_v28 = vpop.eup %745 }
 0x3e7   :  { %v748_v29 = vpop.eup %747  ;;  %v562_v30 = vsel %vm547_vm5, %v746_v28, %v742_v26 }
 0x3e8   :  { %v563_v31 = vsel %vm547_vm5, %v748_v29, %v744_v27 }
 0x3e9   :  { %v566_v32 = vcombine.low %v562_v30, %v563_v31 }
 0x3eb   :  { %634 = vst.sshfl [vmem:[#allocation2] sm:$0x33 pattern:$0x76325410] %v566_v32 }
 0x3ec   :  { %760 = shalt.err (!%p757_p4)
}
 0x3ed   :  { %s761_s28 = scalar_lea.hbm %s1046_s3, 64 }
 0x3ee   :  { %p762_p5 = scmp.ne.s32.totalorder %s1046_s3, %s761_s28  ;;  %p765_p6 = scmp.lt.u32.totalorder %s761_s28, %s1046_s3 }
 0x3f0   :  { %p767_p7 = pnand %p765_p6, %p762_p5 }
 0x3f2   :  { %770 = shalt.err (!%p767_p7)
}
 0x3f3   :  { %585 = dma.vmem_to_hbm [thread:$0]  %s583_s2, 64, %s1046_s3, [#allocation3]  }
 0x3f4   :  { %771 = dma.done.wait [#allocation3], 64  }
 0x3f5   :  { %772 = vsyncadd [#allocation3], 4294967232 }
 0x3f6   :  { %589 = vsyncpa [#allocation3], 1 }

</bundles_post_ra>
